<compile_context>
chip_gen: v7x
topology: tpu7x:2x2x1
jax: 0.10.0
libtpu: 0.0.40
codegen_flags: <defaults>
</compile_context>

<pallas_src>
import jax
import jax.numpy as jnp
from jax import lax
from jax.experimental import pallas as pl
from jax.experimental.pallas import tpu as pltpu


def _round_up(x, m):
    return ((x + m - 1) // m) * m


def cls_head_kernel(dec_ref, wpred_ref, wcls_ref, bcls_ref, lm_ref, cls_ref):
    # dec_ref   : (tm, D)      activation tile (bf16)
    # wpred_ref : (tv, D)      LM-head weight tile (bf16, nn.Linear layout)
    # wcls_ref  : (C_pad, D)   classifier weight (bf16, padded to 128 lanes)
    # bcls_ref  : (1, C_pad)   classifier bias (f32)
    # lm_ref    : (tm, tv)     lm_logits tile (f32)
    # cls_ref   : (tm, C_pad)  cls_logits tile (f32), written once per row tile
    dec = dec_ref[...]

    # lm_logits: contract D (dim 1 of both operands) directly — no .T,
    # the MXU consumes the (tv, D) layout as-is; f32 accumulation.
    lm = lax.dot_general(
        dec, wpred_ref[...],
        dimension_numbers=(((1,), (1,)), ((), ())),
        preferred_element_type=jnp.float32,
    )
    lm_ref[...] = lm.astype(lm_ref.dtype)

    # Classifier head: negligible FLOPs, compute only on the first vocab tile.
    @pl.when(pl.program_id(1) == 0)
    def _():
        cls = lax.dot_general(
            dec, wcls_ref[...],
            dimension_numbers=(((1,), (1,)), ((), ())),
            preferred_element_type=jnp.float32,
        )
        cls = cls + bcls_ref[...]          # bias added in f32 before downcast
        cls_ref[...] = cls.astype(cls_ref.dtype)


def cls_head_pallas(dec_out, w_pred, w_cls, b_cls, *, tm=256, tv=512,
                    compute_dtype=jnp.bfloat16, out_dtype=jnp.float32):
    """dec_out: (B, S, D).  Returns (lm_logits (B,S,V), cls_logits (B,S,C)).

    tm: row tile (tokens).  256 suits v6e/v7x MXU; use 128 on v5e.
    tv: vocab tile (multiple of 128 lanes), clamped/padded to the vocab size.
    """
    B, S, D = dec_out.shape
    V, Dp = w_pred.shape
    C, Dc = w_cls.shape
    assert D == Dp == Dc

    M = B * S
    # Row tile: MXU-sized by default, clamped (multiple of 8) for small M.
    tm = min(tm, _round_up(M, 8))
    M_pad = _round_up(M, tm)
    # Vocab tile: multiple of 128, clamped for small vocabularies.
    tv = min(tv, _round_up(V, 128))
    V_pad = _round_up(V, tv)
    # Classifier lanes padded to 128 so its store is lane-dense (no vst.msk).
    C_pad = _round_up(max(C, 128), 128)

    dec2d = dec_out.reshape(M, D).astype(compute_dtype)
    if M_pad != M:
        dec2d = jnp.pad(dec2d, ((0, M_pad - M), (0, 0)))
    wp = w_pred.astype(compute_dtype)
    if V_pad != V:
        wp = jnp.pad(wp, ((0, V_pad - V), (0, 0)))
    wc = jnp.pad(w_cls.astype(compute_dtype), ((0, C_pad - C), (0, 0)))
    bc = jnp.pad(b_cls.astype(jnp.float32), (0, C_pad - C)).reshape(1, C_pad)

    grid = (M_pad // tm, V_pad // tv)

    # Scoped-VMEM request sized from the (double-buffered) tile footprint,
    # clamped to 48 MiB so it stays safe on v7x (64 MiB physical VMEM).
    esz = jnp.dtype(compute_dtype).itemsize
    tile_bytes = 2 * esz * (tm * D + tv * D + C_pad * D)        # input blocks
    tile_bytes += 2 * 4 * (tm * tv + tm * C_pad + C_pad)        # output + bias
    vmem_limit = int(max(32 << 20, min(2 * tile_bytes, 48 << 20)))

    lm2d, cls2d = pl.pallas_call(
        cls_head_kernel,
        out_shape=(
            jax.ShapeDtypeStruct((M_pad, V_pad), out_dtype),
            jax.ShapeDtypeStruct((M_pad, C_pad), out_dtype),
        ),
        grid_spec=pltpu.PrefetchScalarGridSpec(
            num_scalar_prefetch=0,
            grid=grid,
            in_specs=[
                pl.BlockSpec((tm, D), lambda i, j: (i, 0)),      # activations
                pl.BlockSpec((tv, D), lambda i, j: (j, 0)),      # LM-head tile
                pl.BlockSpec((C_pad, D), lambda i, j: (0, 0)),   # classifier W
                pl.BlockSpec((1, C_pad), lambda i, j: (0, 0)),   # classifier b
            ],
            out_specs=[
                pl.BlockSpec((tm, tv), lambda i, j: (i, j)),     # lm_logits
                pl.BlockSpec((tm, C_pad), lambda i, j: (i, 0)),  # cls_logits
            ],
        ),
        compiler_params=pltpu.CompilerParams(
            # cls_logits block is revisited across the vocab axis (written
            # only at j == 0), so that axis must be "arbitrary"; the row
            # axis is fully parallel (megacore-shardable).
            dimension_semantics=("parallel", "arbitrary"),
            vmem_limit_bytes=vmem_limit,
        ),
    )(dec2d, wp, wc, bc)

    lm_logits = lm2d[:M, :V].reshape(B, S, V)
    cls_logits = cls2d[:M, :C].reshape(B, S, C)
    return lm_logits, cls_logits


class GPTStub:
    """Deterministic stand-in for the `gpt` backbone: embedding lookup only."""

    def __init__(self, key, vocab_size, d_model):
        self.word_embedding_weight = (
            0.02 * jax.random.normal(key, (vocab_size, d_model), jnp.float32)
        )

    def __call__(self, token_ids):
        # token_ids: (B, S) int32 -> (B, S, D)
        return jnp.take(self.word_embedding_weight, token_ids, axis=0)


if __name__ == "__main__":
    # config: d_model=32, vocab_size=128, n_class=8; inputs: batch=2, seq=8
    d_model, vocab_size, n_class = 32, 128, 8
    B, S = 2, 8

    key = jax.random.PRNGKey(0)
    k_emb, k_pred, k_clsw, k_clsb, k_x = jax.random.split(key, 5)

    gpt = GPTStub(k_emb, vocab_size, d_model)

    # prediction: nn.Linear(d_model, vocab_size, bias=False) -> weight (V, D)
    # (the PyTorch code sets `.weights`, a typo, so no real tying happens;
    #  we initialize an independent weight deterministically)
    w_pred = 0.02 * jax.random.normal(k_pred, (vocab_size, d_model), jnp.float32)

    # classifier: nn.Linear(d_model, n_class) with normal(std=0.02) weight
    w_cls = 0.02 * jax.random.normal(k_clsw, (n_class, d_model), jnp.float32)
    b_cls = 0.01 * jax.random.normal(k_clsb, (n_class,), jnp.float32)

    # token ids
    x = jax.random.randint(k_x, (B, S), 0, vocab_size, dtype=jnp.int32)

    # forward: dec_out = gpt(x); lm_logits = prediction(dec_out);
    #          cls_logits = classifier(dec_out)
    dec_out = gpt(x)
    lm_logits, cls_logits = cls_head_pallas(dec_out, w_pred, w_cls, b_cls)
    jax.block_until_ready((lm_logits, cls_logits))

    # reference: same bf16-operand / f32-accumulate math in plain JAX
    f32 = jnp.float32
    dec_bf = dec_out.astype(jnp.bfloat16).astype(f32)
    wp_bf = w_pred.astype(jnp.bfloat16).astype(f32)
    wc_bf = w_cls.astype(jnp.bfloat16).astype(f32)
    hp = jax.lax.Precision.HIGHEST
    lm_ref = jnp.einsum("bsd,vd->bsv", dec_bf, wp_bf, precision=hp)
    cls_ref = jnp.einsum("bsd,cd->bsc", dec_bf, wc_bf, precision=hp) + b_cls

    assert lm_logits.shape == (B, S, vocab_size)
    assert cls_logits.shape == (B, S, n_class)
    assert jnp.allclose(lm_logits, lm_ref, atol=1e-3, rtol=1e-2)
    assert jnp.allclose(cls_logits, cls_ref, atol=1e-3, rtol=1e-2)

    print("KERNEL_OK")
</pallas_src>

<mosaic_0001>
module attributes {stable_mosaic.version = 11 : i64} {
  func.func @cls_head_kernel(%arg0: i32, %arg1: i32, %arg2: memref<16x32xbf16, #tpu.memory_space<vmem>>, %arg3: memref<128x32xbf16, #tpu.memory_space<vmem>>, %arg4: memref<128x32xbf16, #tpu.memory_space<vmem>>, %arg5: memref<1x128xf32, #tpu.memory_space<vmem>>, %arg6: memref<16x128xf32, #tpu.memory_space<vmem>>, %arg7: memref<16x128xf32, #tpu.memory_space<vmem>>) attributes {dimension_semantics = [#tpu.dimension_semantics<parallel>, #tpu.dimension_semantics<arbitrary>], iteration_bounds = array<i64: 1, 1>, scalar_prefetch = 0 : i64, scratch_operands = 0 : i64, tpu.core_type = #tpu.core_type<tc>, window_params = [{transform_indices = @transform_0, window_bounds = array<i64: 16, 32>}, {transform_indices = @transform_1, window_bounds = array<i64: 128, 32>}, {pipeline_mode = #tpu.pipeline_mode<synchronous>, transform_indices = @transform_2, window_bounds = array<i64: 128, 32>}, {pipeline_mode = #tpu.pipeline_mode<synchronous>, transform_indices = @transform_3, window_bounds = array<i64: 1, 128>}, {transform_indices = @transform_4, window_bounds = array<i64: 16, 128>}, {transform_indices = @transform_5, window_bounds = array<i64: 16, 128>}]} {
    %c0 = arith.constant 0 : index
    %c0_0 = arith.constant 0 : index
    %0 = vector.load %arg2[%c0, %c0_0] : memref<16x32xbf16, #tpu.memory_space<vmem>>, vector<16x32xbf16>
    %c0_1 = arith.constant 0 : index
    %c0_2 = arith.constant 0 : index
    %1 = vector.load %arg3[%c0_1, %c0_2] : memref<128x32xbf16, #tpu.memory_space<vmem>>, vector<128x32xbf16>
    %cst = arith.constant dense<0.000000e+00> : vector<16x128xf32>
    %2 = tpu.matmul %0, %1, %cst {dimension_numbers = #tpu.dot_dimension_numbers<[1], [1], [0], [0], [0, 0, 1, 0], [], []>} : vector<16x32xbf16>, vector<128x32xbf16>, vector<16x128xf32> -> vector<16x128xf32>
    %c0_3 = arith.constant 0 : index
    %c0_4 = arith.constant 0 : index
    %3 = vector.load %arg6[%c0_3, %c0_4] : memref<16x128xf32, #tpu.memory_space<vmem>>, vector<16x128xf32>
    tpu.vector_store %arg6[%c0_3, %c0_4], %2 {strides = array<i32>} : memref<16x128xf32, #tpu.memory_space<vmem>>, vector<16x128xf32>,
    %c0_i32 = arith.constant 0 : i32
    %4 = arith.cmpi eq, %arg1, %c0_i32 : i32
    %5 = arith.extui %4 : i1 to i32
    %c0_i32_5 = arith.constant 0 : i32
    %6 = arith.cmpi ne, %5, %c0_i32_5 : i32
    scf.if %6 {
      %c0_6 = arith.constant 0 : index
      %c0_7 = arith.constant 0 : index
      %7 = vector.load %arg4[%c0_6, %c0_7] : memref<128x32xbf16, #tpu.memory_space<vmem>>, vector<128x32xbf16>
      %cst_8 = arith.constant dense<0.000000e+00> : vector<16x128xf32>
      %8 = tpu.matmul %0, %7, %cst_8 {dimension_numbers = #tpu.dot_dimension_numbers<[1], [1], [0], [0], [0, 0, 1, 0], [], []>} : vector<16x32xbf16>, vector<128x32xbf16>, vector<16x128xf32> -> vector<16x128xf32>
      %c0_9 = arith.constant 0 : index
      %c0_10 = arith.constant 0 : index
      %9 = vector.load %arg5[%c0_9, %c0_10] : memref<1x128xf32, #tpu.memory_space<vmem>>, vector<1x128xf32>
      %10 = vector.broadcast %9 : vector<1x128xf32> to vector<16x128xf32>
      %11 = arith.addf %8, %10 : vector<16x128xf32>
      %c0_11 = arith.constant 0 : index
      %c0_12 = arith.constant 0 : index
      %12 = vector.load %arg7[%c0_11, %c0_12] : memref<16x128xf32, #tpu.memory_space<vmem>>, vector<16x128xf32>
      tpu.vector_store %arg7[%c0_11, %c0_12], %11 {strides = array<i32>} : memref<16x128xf32, #tpu.memory_space<vmem>>, vector<16x128xf32>,
    } else {
    }
    return
  }
  func.func @transform_0(%arg0: i32, %arg1: i32) -> (i32, i32) {
    %c0_i32 = arith.constant 0 : i32
    %c0_i32_0 = arith.constant 0 : i32
    return %arg0, %c0_i32 : i32, i32
  }
  func.func @transform_1(%arg0: i32, %arg1: i32) -> (i32, i32) {
    %c0_i32 = arith.constant 0 : i32
    %c0_i32_0 = arith.constant 0 : i32
    return %arg1, %c0_i32 : i32, i32
  }
  func.func @transform_2(%arg0: i32, %arg1: i32) -> (i32, i32) {
    %c0_i32 = arith.constant 0 : i32
    %c0_i32_0 = arith.constant 0 : i32
    %c0_i32_1 = arith.constant 0 : i32
    return %c0_i32, %c0_i32_0 : i32, i32
  }
  func.func @transform_3(%arg0: i32, %arg1: i32) -> (i32, i32) {
    %c0_i32 = arith.constant 0 : i32
    %c0_i32_0 = arith.constant 0 : i32
    %c0_i32_1 = arith.constant 0 : i32
    return %c0_i32, %c0_i32_0 : i32, i32
  }
  func.func @transform_4(%arg0: i32, %arg1: i32) -> (i32, i32) {
    %c0_i32 = arith.constant 0 : i32
    return %arg0, %arg1 : i32, i32
  }
  func.func @transform_5(%arg0: i32, %arg1: i32) -> (i32, i32) {
    %c0_i32 = arith.constant 0 : i32
    %c0_i32_0 = arith.constant 0 : i32
    return %arg0, %c0_i32 : i32, i32
  }
}

</mosaic_0001>

<bundles_post_ra>
// kernel: tpu_custom_call.1
= control target key start
LH: loop header
LB: loop body
LE: loop exit
PB: predicated region body
PF: predicated region fallthrough
CT: control target
= control target key end

     0   :  { %11 = vsyncpa [#allocation3], 0  ;;  %v471_v1 = vmov 0.0   ;;  %vm85_vm0 = vcmask 261120   ;;  %vm472_vm1 = vmmov 0   ;;  %s617_s0 = inlined_call_operand.vmem [shape: bf16[16,32], index: 0, kind: input, shape index: {}]   ;;  %s618_s1 = inlined_call_operand.vmem [shape: bf16[128,32], index: 1, kind: input, shape index: {}]   ;;  %s619_s2 = inlined_call_operand.vmem [shape: bf16[128,32], index: 2, kind: input, shape index: {}]   ;;  %s620_s3 = inlined_call_operand.vmem [shape: f32[1,128], index: 3, kind: input, shape index: {}]   ;;  %s621_s4 = inlined_call_operand.hbm [shape: f32[16,128], index: 4, kind: output, shape index: {0}]   ;;  %s622_s5 = inlined_call_operand.hbm [shape: f32[16,128], index: 5, kind: output, shape index: {1}]  }
   0x1   :  { %v406_v0 = vld [vmem:[%s618_s1] sm:$0xff]   ;;  %360 = vmatprep.subr.bf16.mxu0 %v471_v1  ;;  %380 = vmatprep.subr.bf16.mxu1 %v471_v1  ;;  %v408_v5 = vld [vmem:[%s618_s1 + $0x8] sm:$0xff]   ;;  %v410_v9 = vld [vmem:[%s618_s1 + $0x10] sm:$0xff]  }
   0x2   :  { %v407_v2 = vld [vmem:[%s619_s2] sm:$0xff]   ;;  %v90_v3 = vsel %vm85_vm0, %v406_v0, 0  ;;  %v409_v6 = vld [vmem:[%s619_s2 + $0x8] sm:$0xff]   ;;  %v93_v7 = vsel %vm85_vm0, %v408_v5, 0  ;;  %v411_v10 = vld [vmem:[%s619_s2 + $0x10] sm:$0xff]   ;;  %v96_v11 = vsel %vm85_vm0, %v410_v9, 0  ;;  %376 = vmatprep.mubr.msk.bf16.mxu0 %vm472_vm1, %v471_v1  ;;  %396 = vmatprep.mubr.msk.bf16.mxu1 %vm472_vm1, %v471_v1 }
   0x3   :  { %361 = vmatpush3.bf16.xpose.msra.mxu0 %v90_v3  ;;  %v224_v4 = vsel %vm85_vm0, %v407_v2, 0  ;;  %v227_v8 = vsel %vm85_vm0, %v409_v6, 0  ;;  %v230_v12 = vsel %vm85_vm0, %v411_v10, 0 }
   0x4   :  { %381 = vmatpush3.bf16.xpose.msra.mxu1 %v224_v4  ;;  %362 = vmatprep.subr.bf16.mxu0 %v471_v1 }
   0x5   :  { %382 = vmatprep.subr.bf16.mxu1 %v471_v1 }
   0xb   :  { %363 = vmatpush3.bf16.xpose.msra.mxu0 %v93_v7 }
   0xc   :  { %383 = vmatpush3.bf16.xpose.msra.mxu1 %v227_v8  ;;  %364 = vmatprep.subr.bf16.mxu0 %v471_v1 }
   0xd   :  { %384 = vmatprep.subr.bf16.mxu1 %v471_v1 }
   0xe   :  { %12 = vsyncpa [#allocation5], 0  ;;  %v412_v13 = vld [vmem:[%s618_s1 + $0x18] sm:$0xff]   ;;  %v414_v17 = vld [vmem:[%s618_s1 + $0x20] sm:$0xff]  }
   0xf   :  { %v413_v14 = vld [vmem:[%s619_s2 + $0x18] sm:$0xff]   ;;  %v99_v15 = vsel %vm85_vm0, %v412_v13, 0  ;;  %v415_v18 = vld [vmem:[%s619_s2 + $0x20] sm:$0xff]   ;;  %v102_v19 = vsel %vm85_vm0, %v414_v17, 0  ;;  %v416_v21 = vld [vmem:[%s618_s1 + $0x28] sm:$0xff]  }
  0x10   :  { %v233_v16 = vsel %vm85_vm0, %v413_v14, 0  ;;  %v236_v20 = vsel %vm85_vm0, %v415_v18, 0  ;;  %v417_v22 = vld [vmem:[%s619_s2 + $0x28] sm:$0xff]   ;;  %v105_v23 = vsel %vm85_vm0, %v416_v21, 0  ;;  %v418_v25 = vld [vmem:[%s618_s1 + $0x30] sm:$0xff]   ;;  %v420_v29 = vld [vmem:[%s618_s1 + $0x38] sm:$0xff]  }
  0x11   :  { %v239_v24 = vsel %vm85_vm0, %v417_v22, 0  ;;  %v419_v26 = vld [vmem:[%s619_s2 + $0x30] sm:$0xff]   ;;  %v108_v27 = vsel %vm85_vm0, %v418_v25, 0  ;;  %v421_v30 = vld [vmem:[%s619_s2 + $0x38] sm:$0xff]   ;;  %v111_v31 = vsel %vm85_vm0, %v420_v29, 0  ;;  %v422_v33 = vld [vmem:[%s617_s0] sm:$0xff]  }
  0x12   :  { %v242_v28 = vsel %vm85_vm0, %v419_v26, 0  ;;  %v245_v32 = vsel %vm85_vm0, %v421_v30, 0  ;;  %s473_s1 = smov [#allocation2]   ;;  %v332_v34 = vld [vmem:[%s620_s3] ss:$0 sm:$0xff]  ;;  %s474_s2 = smov [#allocation4]  }
  0x13   :  { %365 = vmatpush3.bf16.xpose.msra.mxu0 %v96_v11  ;;  %s295_s27 = sshll.u32 %s473_s1, 4  ;;  %s307_s30 = sshll.u32 %s474_s2, 4  ;;  %s579_s27 = int_to_ptr.vmem [resolvable:$true] %s295_s27  ;;  %s581_s30 = int_to_ptr.vmem [resolvable:$true] %s307_s30 }
  0x14   :  { %385 = vmatpush3.bf16.xpose.msra.mxu1 %v230_v12  ;;  %366 = vmatprep.subr.bf16.mxu0 %v471_v1  ;;  %s423_s0 = scalar_lea.vmem %s579_s27, 256  ;;  %p428_p1 = scmp.lt.s32.totalorder %s579_s27, %s579_s27 }
  0x15   :  { %386 = vmatprep.subr.bf16.mxu1 %v471_v1  ;;  %p424_p0 = scmp.ne.s32.totalorder %s579_s27, %s423_s0  ;;  %p429_p2 = scmp.lt.s32.totalorder %s423_s0, %s423_s0 }
  0x17   :  { %p430_p3 = por %p429_p2, %p428_p1 }
  0x19   :  { %p431_p4 = pnand %p430_p3, %p424_p0 }
  0x1b   :  { %367 = vmatpush3.bf16.xpose.msra.mxu0 %v99_v15 }
  0x1c   :  { %387 = vmatpush3.bf16.xpose.msra.mxu1 %v233_v16  ;;  %368 = vmatprep.subr.bf16.mxu0 %v471_v1 }
  0x1d   :  { %388 = vmatprep.subr.bf16.mxu1 %v471_v1 }
  0x23   :  { %369 = vmatpush3.bf16.xpose.msra.mxu0 %v102_v19 }
  0x24   :  { %389 = vmatpush3.bf16.xpose.msra.mxu1 %v236_v20  ;;  %370 = vmatprep.subr.bf16.mxu0 %v471_v1 }
  0x25   :  { %390 = vmatprep.subr.bf16.mxu1 %v471_v1 }
  0x2b   :  { %371 = vmatpush3.bf16.xpose.msra.mxu0 %v105_v23 }
  0x2c   :  { %391 = vmatpush3.bf16.xpose.msra.mxu1 %v239_v24  ;;  %372 = vmatprep.subr.bf16.mxu0 %v471_v1 }
  0x2d   :  { %392 = vmatprep.subr.bf16.mxu1 %v471_v1 }
  0x33   :  { %373 = vmatpush3.bf16.xpose.msra.mxu0 %v108_v27 }
  0x34   :  { %393 = vmatpush3.bf16.xpose.msra.mxu1 %v242_v28  ;;  %374 = vmatprep.subr.bf16.mxu0 %v471_v1 }
  0x35   :  { %394 = vmatprep.subr.bf16.mxu1 %v471_v1 }
  0x3b   :  { %375 = vmatpush3.bf16.xpose.msra.mxu0 %v111_v31 }
  0x3c   :  { %395 = vmatpush3.bf16.xpose.msra.mxu1 %v245_v32 }
  0x42   :  { %377 = vmatmul.mubr.msk.bf16.vlgmr.msra.gmra.mrb[0].mxu0 %vm85_vm0, %v422_v33 }
  0x43   :  { %397 = vmatmul.mubr.msk.bf16.vlgmr.msra.gmra.mrb[0].mxu1 %vm85_vm0, %v422_v33 }
 0x115   :  { %v147_v35 = vpop.f32.mrb[0].mxu0 }
 0x116   :  { %154 = vst [vmem:[#allocation2] sm:$0xff] %v147_v35  ;;  %v281_v36 = vpop.f32.mrb[0].mxu1  ;;  %v378_v37 = vpop.f32.mrb[1].mxu0 }
 0x117   :  { %v282_v38 = vadd.f32 %v332_v34, %v281_v36  ;;  %v398_v39 = vpop.f32.mrb[1].mxu1  ;;  %v150_v40 = vpop.f32.mrb[2].mxu0 }
 0x118   :  { %155 = vst [vmem:[#allocation2 + $0x8] sm:$0xff] %v150_v40  ;;  %v284_v41 = vpop.f32.mrb[2].mxu1  ;;  %v379_v42 = vpop.f32.mrb[3].mxu0 }
 0x119   :  { %288 = vst [vmem:[#allocation4] sm:$0xff] %v282_v38  ;;  %v285_v43 = vadd.f32 %v332_v34, %v284_v41  ;;  %v399_v44 = vpop.f32.mrb[3].mxu1 }
 0x11a   :  { %434 = shalt.err (!%p431_p4)
}
 0x11b   :  { %s435_s7 = scalar_lea.hbm %s621_s4, 256 }
 0x11c   :  { %p436_p5 = scmp.ne.s32.totalorder %s621_s4, %s435_s7  ;;  %p439_p6 = scmp.lt.u32.totalorder %s435_s7, %s621_s4 }
 0x11e   :  { %p441_p7 = pnand %p439_p6, %p436_p5 }
 0x120   :  { %444 = shalt.err (!%p441_p7)
}
 0x121   :  { %s475_s12 = smov 128   ;;  %s476_s13 = smov 8   ;;  %289 = vst [vmem:[#allocation4 + $0x8] sm:$0xff] %v285_v43 }
 0x122   :  { %301 = dma.vmem_to_hbm [thread:$0]  %s579_s27, 256, %s621_s4, [#allocation3], %s475_s12, %s475_s12, %s476_s13  }
 0x123   :  { %s445_s16 = scalar_lea.vmem %s581_s30, 256  ;;  %p450_p9 = scmp.lt.s32.totalorder %s581_s30, %s581_s30 }
 0x124   :  { %p446_p8 = scmp.ne.s32.totalorder %s581_s30, %s445_s16  ;;  %p451_p10 = scmp.lt.s32.totalorder %s445_s16, %s445_s16 }
 0x126   :  { %p452_p11 = por %p451_p10, %p450_p9 }
 0x128   :  { %p453_p12 = pnand %p452_p11, %p446_p8 }
 0x12a   :  { %456 = shalt.err (!%p453_p12)
}
 0x12b   :  { %s457_s19 = scalar_lea.hbm %s622_s5, 256 }
 0x12c   :  { %p458_p13 = scmp.ne.s32.totalorder %s622_s5, %s457_s19  ;;  %p461_p0 = scmp.lt.u32.totalorder %s457_s19, %s622_s5 }
 0x12e   :  { %p463_p1 = pnand %p461_p0, %p458_p13 }
 0x130   :  { %466 = shalt.err (!%p463_p1)
}
 0x131   :  { %313 = dma.vmem_to_hbm [thread:$0]  %s581_s30, 256, %s622_s5, [#allocation5], %s475_s12, %s475_s12, %s476_s13  }
 0x132   :  { %467 = dma.done.wait [#allocation3], 256  }
 0x133   :  { %468 = vsyncadd [#allocation3], 4294967040 }
 0x134   :  { %469 = dma.done.wait [#allocation5], 256  }
 0x135   :  { %470 = vsyncadd [#allocation5], 4294967040 }
 0x136   :  { %320 = vsyncpa [#allocation3], 1 }
 0x137   :  { %321 = vsyncpa [#allocation5], 1 }

</bundles_post_ra>
